<compile_context>
chip_gen: v7x
topology: tpu7x:2x2x1
jax: 0.10.0
libtpu: 0.0.40
codegen_flags: <defaults>
</compile_context>

<pallas_src>
import math
from itertools import product as cartesian_product

import jax
import jax.numpy as jnp
from jax.experimental import pallas as pl
from jax.experimental.pallas import tpu as pltpu


# --------------------------------------------------------------------------- helpers
def _round_up(x, m):
    return ((x + m - 1) // m) * m


def _pick_tile(n, candidates):
    for c in candidates:
        if n % c == 0:
            return c
    return n


def _pad_rows_to_8(a):
    m = a.shape[0]
    mp = _round_up(m, 8)
    if mp != m:
        a = jnp.pad(a, ((0, mp - m), (0, 0)))
    return a


# --------------------------------------------------------------------------- Pallas: conv matmul with fused BN-statistics epilogue
def _conv_matmul_kernel(a_ref, b_ref, o_ref, stats_ref, acc_ref):
    @pl.when(pl.program_id(2) == 0)
    def _():
        acc_ref[...] = jnp.zeros_like(acc_ref)

    acc_ref[...] += jnp.dot(a_ref[...], b_ref[...],
                            preferred_element_type=jnp.float32)

    @pl.when(pl.program_id(2) == pl.num_programs(2) - 1)
    def _():
        acc = acc_ref[...]
        o_ref[...] = acc.astype(o_ref.dtype)
        # fused per-channel reduction for BatchNorm batch statistics (rows 2..7 unused)
        stats_ref[0:1, :] = jnp.sum(acc, axis=0, keepdims=True)
        stats_ref[1:2, :] = jnp.sum(acc * acc, axis=0, keepdims=True)


def conv_matmul(a, w):
    """a: (M, K) bf16 patch matrix (M % 8 == 0), w: (K, Np) bf16 weight panel
    (Np % 128 == 0).  Returns (y (M, Np) bf16, col_sum (Np,) f32, col_sumsq (Np,) f32)."""
    m, k = a.shape
    k2, np_ = w.shape
    assert k == k2 and m % 8 == 0 and np_ % 128 == 0
    tm = _pick_tile(m, (512, 256, 128, 64, 32, 16, 8))
    tn = _pick_tile(np_, (256, 128))
    tk = k if k <= 512 else _pick_tile(k, (512, 384, 256, 128))
    mt, nt, kt = m // tm, np_ // tn, k // tk
    y, stats = pl.pallas_call(
        _conv_matmul_kernel,
        out_shape=(jax.ShapeDtypeStruct((m, np_), jnp.bfloat16),
                   jax.ShapeDtypeStruct((mt * 8, np_), jnp.float32)),
        grid_spec=pltpu.PrefetchScalarGridSpec(
            num_scalar_prefetch=0,
            grid=(mt, nt, kt),
            in_specs=[pl.BlockSpec((tm, tk), lambda i, j, kk: (i, kk)),
                      pl.BlockSpec((tk, tn), lambda i, j, kk: (kk, j))],
            out_specs=(pl.BlockSpec((tm, tn), lambda i, j, kk: (i, j)),
                       pl.BlockSpec((8, tn), lambda i, j, kk: (i, j))),
            scratch_shapes=[pltpu.VMEM((tm, tn), jnp.float32)]),
        compiler_params=pltpu.CompilerParams(
            dimension_semantics=("parallel", "parallel", "arbitrary")),
    )(a, w)
    stats = stats.reshape(mt, 8, np_)
    return y, stats[:, 0, :].sum(axis=0), stats[:, 1, :].sum(axis=0)


# --------------------------------------------------------------------------- Pallas: fused (BN affine | bias) + PReLU + channel un-pad
def _affine_act_kernel(x_ref, p_ref, o_ref):
    c = o_ref.shape[-1]
    x = x_ref[...][:, :c].astype(jnp.float32)
    scale, shift, slope = p_ref[0:1, :c], p_ref[1:2, :c], p_ref[2:3, :c]
    y = x * scale + shift
    o_ref[...] = jnp.where(y > 0, y, y * slope).astype(o_ref.dtype)


def affine_act(y2d, scale, shift, slope, out_rows, out_cols, out_dtype):
    """y2d: (Mp, Np) lane-padded matmul output.  Applies y*scale+shift then PReLU(slope)
    on the first out_cols channels and writes the exact-width result in one pass."""
    mp, np_ = y2d.shape
    c = out_cols
    params = jnp.zeros((8, np_), jnp.float32)
    params = params.at[0, :c].set(scale.astype(jnp.float32))
    params = params.at[1, :c].set(shift.astype(jnp.float32))
    params = params.at[2, :c].set(jnp.broadcast_to(jnp.asarray(slope, jnp.float32), (c,)))
    tr = _pick_tile(mp, (512, 256, 128, 64, 32, 16, 8))
    out = pl.pallas_call(
        _affine_act_kernel,
        out_shape=jax.ShapeDtypeStruct((mp, c), out_dtype),
        grid_spec=pltpu.PrefetchScalarGridSpec(
            num_scalar_prefetch=0,
            grid=(mp // tr,),
            in_specs=[pl.BlockSpec((tr, np_), lambda i: (i, 0)),
                      pl.BlockSpec((8, np_), lambda i: (0, 0))],
            out_specs=pl.BlockSpec((tr, c), lambda i: (i, 0))),
        compiler_params=pltpu.CompilerParams(dimension_semantics=("parallel",)),
    )(y2d, params)
    return out if out_rows == mp else out[:out_rows]


# --------------------------------------------------------------------------- Pallas: tanh (lane-dense large blocks)
def _tanh_kernel(x_ref, o_ref):
    o_ref[...] = jnp.tanh(x_ref[...].astype(jnp.float32)).astype(o_ref.dtype)


def tanh_pallas(x):
    shape = x.shape
    flat = x.reshape(-1)
    n = flat.shape[0]
    cols = 512
    rows = _round_up(pl.cdiv(n, cols), 8)
    pad = rows * cols - n
    if pad:
        flat = jnp.pad(flat, (0, pad))
    x2 = flat.reshape(rows, cols)
    tr = _pick_tile(rows, (512, 256, 128, 64, 32, 16, 8))
    out = pl.pallas_call(
        _tanh_kernel,
        out_shape=jax.ShapeDtypeStruct((rows, cols), jnp.float32),
        grid_spec=pltpu.PrefetchScalarGridSpec(
            num_scalar_prefetch=0,
            grid=(rows // tr,),
            in_specs=[pl.BlockSpec((tr, cols), lambda i: (i, 0))],
            out_specs=pl.BlockSpec((tr, cols), lambda i: (i, 0))),
        compiler_params=pltpu.CompilerParams(dimension_semantics=("parallel",)),
    )(x2)
    return out.reshape(-1)[:n].reshape(shape)


# --------------------------------------------------------------------------- im2col glue (channels-last: pure lane-axis concat, bf16)
def _patch_matrix(slabs, k_true, k_pad):
    # TODO(synk): fuse this tap-window gather into the matmul via manual shifted-window DMA
    # so the patch slab never round-trips through HBM.
    lead = slabs[0].shape[:-1]
    parts = [s.astype(jnp.bfloat16) for s in slabs]
    if k_pad > k_true:
        parts.append(jnp.zeros(lead + (k_pad - k_true,), jnp.bfloat16))
    a = parts[0] if len(parts) == 1 else jnp.concatenate(parts, axis=-1)
    m = 1
    for d in lead:
        m *= d
    return a.reshape(m, k_pad)


# --------------------------------------------------------------------------- MONAI-style building blocks (channels-last activations)
class Convolution:
    """Conv3d / ConvTranspose3d (bias) -> BatchNorm3d (batch stats, eps=1e-5) -> PReLU(0.25).
    conv_only skips norm/act (bias still applied)."""

    def __init__(self, key, in_c, out_c, strides=1, kernel=3, transposed=False,
                 conv_only=False):
        self.in_c, self.out_c = in_c, out_c
        self.stride, self.k = int(strides), int(kernel)
        self.padding = (self.k - 1) // 2
        self.transposed = transposed
        self.conv_only = conv_only
        self.np_ = _round_up(out_c, 128)

        k = self.k
        fan_in = in_c * k ** 3
        wkey, _ = jax.random.split(key)
        wshape = (in_c, out_c, k, k, k) if transposed else (out_c, in_c, k, k, k)
        w = jax.random.normal(wkey, wshape, jnp.float32) / math.sqrt(fan_in)
        self.b = jnp.zeros((out_c,), jnp.float32)          # Conv bias (PyTorch bias=True)
        if not conv_only:
            self.gamma = jnp.ones((out_c,), jnp.float32)   # BatchNorm3d affine init
            self.beta = jnp.zeros((out_c,), jnp.float32)
            self.slope = 0.25                              # nn.PReLU() default

        # Pre-pack matmul-ready weight panels once (bf16, lane-padded).
        if transposed and self.stride == 2:
            assert k == 3, "polyphase transposed-conv decomposition implemented for kernel 3"
            self.classes = self._pack_transposed(w)
        else:
            if transposed:                                 # stride-1 transposed == flipped conv
                w = jnp.flip(w, axis=(2, 3, 4)).transpose(1, 0, 2, 3, 4)
                self.padding = k - 1 - self.padding
            self.kk, self.kkp, self.wmat = self._pack_conv(w)

    # ---- weight packing ----------------------------------------------------
    @staticmethod
    def _pad_k(k_true):
        return _round_up(k_true, 8) if k_true < 128 else _round_up(k_true, 128)

    def _pack_conv(self, w):
        o, cin, k = w.shape[0], w.shape[1], self.k
        k_true = cin * k ** 3
        k_pad = self._pad_k(k_true)
        wm = w.transpose(2, 3, 4, 1, 0).reshape(k_true, o)
        wm = jnp.pad(wm, ((0, k_pad - k_true), (0, self.np_ - o)))
        return k_true, k_pad, wm.astype(jnp.bfloat16)

    def _pack_transposed(self, w):
        # w: (Cin, O, 3, 3, 3); stride 2, padding 1, output_padding 1.
        # Output z = 2d - 1 + kd:  even z=2j <- (kd=1,d=j);  odd z=2j+1 <- (kd=0,d=j+1),(kd=2,d=j)
        cin, o = w.shape[0], w.shape[1]

        def axis_taps(par):
            return [(1, 0)] if par == 0 else [(0, 1), (2, 0)]

        classes = []
        for pz, py, px in cartesian_product((0, 1), (0, 1), (0, 1)):
            taps = [((kd, kh, kw), (dz, dy, dx))
                    for kd, dz in axis_taps(pz)
                    for kh, dy in axis_taps(py)
                    for kw, dx in axis_taps(px)]
            k_true = cin * len(taps)
            k_pad = self._pad_k(k_true)
            wm = jnp.concatenate([w[:, :, kd, kh, kw] for (kd, kh, kw), _ in taps], axis=0)
            wm = jnp.pad(wm, ((0, k_pad - k_true), (0, self.np_ - o))).astype(jnp.bfloat16)
            classes.append(([off for _, off in taps], wm, k_true, k_pad))
        return classes

    # ---- forward -------------------------------------------------------------
    def _out_dtype(self):
        return jnp.bfloat16 if self.out_c >= 8 else jnp.float32

    def _affine_params(self, sums, sumsqs, count):
        if self.conv_only:
            return jnp.ones((self.out_c,), jnp.float32), self.b, 1.0
        # Conv bias is cancelled exactly by the batch-mean subtraction, so it is omitted here.
        mean = sums[:self.out_c] / count
        var = jnp.maximum(sumsqs[:self.out_c] / count - mean * mean, 0.0)
        scale = self.gamma * jax.lax.rsqrt(var + 1e-5)
        shift = self.beta - mean * scale
        return scale, shift, self.slope

    def __call__(self, x):
        if self.transposed and self.stride == 2:
            return self._forward_transposed(x)
        return self._forward_conv(x)

    def _forward_conv(self, x):
        n, d, h, w, _ = x.shape
        k, s, p = self.k, self.stride, self.padding
        if p:
            x = jnp.pad(x, ((0, 0), (p, p), (p, p), (p, p), (0, 0)))
        dp, hp, wp = d + 2 * p, h + 2 * p, w + 2 * p
        od, oh, ow = (dp - k) // s + 1, (hp - k) // s + 1, (wp - k) // s + 1
        slabs = [x[:, kd:kd + (od - 1) * s + 1:s,
                    kh:kh + (oh - 1) * s + 1:s,
                    kw:kw + (ow - 1) * s + 1:s, :]
                 for kd in range(k) for kh in range(k) for kw in range(k)]
        a = _pad_rows_to_8(_patch_matrix(slabs, self.kk, self.kkp))
        m = n * od * oh * ow
        y2d, sums, sumsqs = conv_matmul(a, self.wmat)
        scale, shift, slope = self._affine_params(sums, sumsqs, m)
        y = affine_act(y2d, scale, shift, slope, m, self.out_c, self._out_dtype())
        return y.reshape(n, od, oh, ow, self.out_c)

    def _forward_transposed(self, x):
        n, d, h, w, _ = x.shape
        x1 = jnp.pad(x, ((0, 0), (0, 1), (0, 1), (0, 1), (0, 0)))
        m_cls = n * d * h * w
        ys, tot_s, tot_ss = [], 0.0, 0.0
        for offsets, wmat, k_true, k_pad in self.classes:
            slabs = [x1[:, dz:dz + d, dy:dy + h, dx:dx + w, :] for dz, dy, dx in offsets]
            a = _pad_rows_to_8(_patch_matrix(slabs, k_true, k_pad))
            y2d, s, ss = conv_matmul(a, wmat)
            ys.append(y2d)
            tot_s, tot_ss = tot_s + s, tot_ss + ss
        scale, shift, slope = self._affine_params(tot_s, tot_ss, 8 * m_cls)
        outs = [affine_act(y, scale, shift, slope, m_cls, self.out_c, self._out_dtype())
                .reshape(n, d, h, w, self.out_c) for y in ys]
        return (jnp.stack(outs, axis=0)
                   .reshape(2, 2, 2, n, d, h, w, self.out_c)
                   .transpose(3, 4, 0, 5, 1, 6, 2, 7)
                   .reshape(n, 2 * d, 2 * h, 2 * w, self.out_c))


class ResidualUnit:
    def __init__(self, key, in_c, out_c, strides=1, kernel=3, subunits=2, last_conv_only=False):
        subunits = max(1, subunits)
        keys = jax.random.split(key, subunits + 1)
        self.convs = []
        sc, sstr = in_c, strides
        for i in range(subunits):
            conv_only = last_conv_only and i == subunits - 1
            self.convs.append(Convolution(keys[i], sc, out_c, strides=sstr,
                                          kernel=kernel, conv_only=conv_only))
            sc, sstr = out_c, 1
        if strides != 1 or in_c != out_c:
            rk = kernel if strides != 1 else 1
            self.residual = Convolution(keys[-1], in_c, out_c, strides=strides,
                                        kernel=rk, conv_only=True)
        else:
            self.residual = None

    def __call__(self, x):
        res = x if self.residual is None else self.residual(x)
        y = x
        for c in self.convs:
            y = c(y)
        return y + res


class UNet:
    """MONAI UNet (dimensions=3) forward structure; channels-last activations."""

    def __init__(self, key, in_c, out_c, channels, strides, num_res_units=2,
                 kernel_size=3, up_kernel_size=3):
        assert len(channels) >= 2 and len(strides) >= len(channels) - 1
        self.num_res_units = num_res_units
        self.kernel_size = kernel_size
        self.up_kernel_size = up_kernel_size
        self.model = self._create_block(key, in_c, out_c, tuple(channels), tuple(strides), True)

    def _get_down_layer(self, key, in_c, out_c, s, is_top):
        if self.num_res_units > 0:
            return ResidualUnit(key, in_c, out_c, strides=s, kernel=self.kernel_size,
                                subunits=self.num_res_units)
        return Convolution(key, in_c, out_c, strides=s, kernel=self.kernel_size)

    def _get_bottom_layer(self, key, in_c, out_c):
        return self._get_down_layer(key, in_c, out_c, 1, False)

    def _get_up_layer(self, key, in_c, out_c, s, is_top):
        kc, kr = jax.random.split(key)
        conv = Convolution(kc, in_c, out_c, strides=s, kernel=self.up_kernel_size,
                           transposed=True,
                           conv_only=is_top and self.num_res_units == 0)
        if self.num_res_units > 0:
            ru = ResidualUnit(kr, out_c, out_c, strides=1, kernel=self.kernel_size,
                              subunits=1, last_conv_only=is_top)
            return lambda x, _c=conv, _r=ru: _r(_c(x))
        return conv

    def _create_block(self, key, inc, outc, channels, strides, is_top):
        kd, ks, ku = jax.random.split(key, 3)
        c, s = channels[0], strides[0]
        if len(channels) > 2:
            sub = self._create_block(ks, c, c, channels[1:], strides[1:], False)
            upc = c * 2
        else:
            sub = self._get_bottom_layer(ks, c, channels[1])
            upc = c + channels[1]
        down = self._get_down_layer(kd, inc, c, s, is_top)
        up = self._get_up_layer(ku, upc, outc, s, is_top)

        def block(x, _down=down, _sub=sub, _up=up):
            d = _down(x)
            return _up(jnp.concatenate([d, _sub(d)], axis=-1))   # SkipConnection (cat)
        return block

    def __call__(self, x):
        return self.model(x)


class CasNetGeneratorPallas:
    """Cascade of n UNet blocks followed by Tanh (matches CasNetGenerator.forward)."""

    def __init__(self, key, img_shape, n_unet_blocks=6,
                 channels=(64, 128, 256, 512, 512, 512, 512),
                 strides=(2, 2, 2, 2, 2, 2, 2)):
        self.img_shape = img_shape
        keys = jax.random.split(key, n_unet_blocks)
        self.unets = [UNet(keys[i], 1, 1, channels, strides, num_res_units=2)
                      for i in range(n_unet_blocks)]

    def __call__(self, x):
        # x: NCDHW (PyTorch convention) -> channels-last internally -> NCDHW out.
        y = jnp.transpose(x, (0, 2, 3, 4, 1))
        for u in self.unets:
            y = u(y)
        y = tanh_pallas(y)
        return jnp.transpose(y, (0, 4, 1, 2, 3))


# --------------------------------------------------------------------------- demo
if __name__ == "__main__":
    key = jax.random.PRNGKey(0)
    pkey, xkey = jax.random.split(key)

    # Small, fast demo config (same architecture code path as the full CasNet config).
    img_shape = (16, 16, 16)
    model = CasNetGeneratorPallas(pkey, img_shape, n_unet_blocks=2,
                                  channels=(8, 16, 32), strides=(2, 2))

    x = jax.random.normal(xkey, (2, 1, *img_shape), jnp.float32)   # NCDHW, in_channels=1
    y = model(x)
    y = jax.block_until_ready(y)

    assert y.shape == x.shape, (y.shape, x.shape)
    assert bool(jnp.all(jnp.isfinite(y)))
    assert bool(jnp.all(jnp.abs(y) <= 1.0 + 1e-6))   # tanh range
    print("KERNEL_OK")
</pallas_src>

<mosaic_0001>
module attributes {stable_mosaic.version = 11 : i64} {
  func.func @_conv_matmul_kernel(%arg0: i32, %arg1: i32, %arg2: i32, %arg3: memref<512x32xbf16, #tpu.memory_space<vmem>>, %arg4: memref<32x128xbf16, #tpu.memory_space<vmem>>, %arg5: memref<512x128xbf16, #tpu.memory_space<vmem>>, %arg6: memref<8x128xf32, #tpu.memory_space<vmem>>, %arg7: memref<512x128xf32, #tpu.memory_space<vmem>>) attributes {dimension_semantics = [#tpu.dimension_semantics<parallel>, #tpu.dimension_semantics<parallel>, #tpu.dimension_semantics<arbitrary>], iteration_bounds = array<i64: 2, 1, 1>, scalar_prefetch = 0 : i64, scratch_operands = 1 : i64, tpu.core_type = #tpu.core_type<tc>, window_params = [{transform_indices = @transform_0, window_bounds = array<i64: 512, 32>}, {transform_indices = @transform_1, window_bounds = array<i64: 32, 128>}, {transform_indices = @transform_2, window_bounds = array<i64: 512, 128>}, {transform_indices = @transform_3, window_bounds = array<i64: 8, 128>}]} {
    %c0_i32 = arith.constant 0 : i32
    %0 = arith.cmpi eq, %arg2, %c0_i32 : i32
    %1 = arith.extui %0 : i1 to i32
    %c0_i32_0 = arith.constant 0 : i32
    %2 = arith.cmpi ne, %1, %c0_i32_0 : i32
    scf.if %2 {
      %cst_10 = arith.constant 0.000000e+00 : f32
      %12 = vector.broadcast %cst_10 : f32 to vector<512x128xf32>
      %c0_11 = arith.constant 0 : index
      %c0_12 = arith.constant 0 : index
      %13 = vector.load %arg7[%c0_11, %c0_12] : memref<512x128xf32, #tpu.memory_space<vmem>>, vector<512x128xf32>
      tpu.vector_store %arg7[%c0_11, %c0_12], %12 {strides = array<i32>} : memref<512x128xf32, #tpu.memory_space<vmem>>, vector<512x128xf32>,
    } else {
    }
    %c0 = arith.constant 0 : index
    %c0_1 = arith.constant 0 : index
    %3 = vector.load %arg7[%c0, %c0_1] : memref<512x128xf32, #tpu.memory_space<vmem>>, vector<512x128xf32>
    %c0_2 = arith.constant 0 : index
    %c0_3 = arith.constant 0 : index
    %4 = vector.load %arg3[%c0_2, %c0_3] : memref<512x32xbf16, #tpu.memory_space<vmem>>, vector<512x32xbf16>
    %c0_4 = arith.constant 0 : index
    %c0_5 = arith.constant 0 : index
    %5 = vector.load %arg4[%c0_4, %c0_5] : memref<32x128xbf16, #tpu.memory_space<vmem>>, vector<32x128xbf16>
    %cst = arith.constant dense<0.000000e+00> : vector<512x128xf32>
    %6 = tpu.matmul %4, %5, %cst {dimension_numbers = #tpu.dot_dimension_numbers<[1], [0], [0], [1], [0, 0, 1, 1], [], []>} : vector<512x32xbf16>, vector<32x128xbf16>, vector<512x128xf32> -> vector<512x128xf32>
    %7 = arith.addf %3, %6 : vector<512x128xf32>
    %c0_6 = arith.constant 0 : index
    %c0_7 = arith.constant 0 : index
    %8 = vector.load %arg7[%c0_6, %c0_7] : memref<512x128xf32, #tpu.memory_space<vmem>>, vector<512x128xf32>
    tpu.vector_store %arg7[%c0_6, %c0_7], %7 {strides = array<i32>} : memref<512x128xf32, #tpu.memory_space<vmem>>, vector<512x128xf32>,
    %c0_i32_8 = arith.constant 0 : i32
    %9 = arith.cmpi eq, %arg2, %c0_i32_8 : i32
    %10 = arith.extui %9 : i1 to i32
    %c0_i32_9 = arith.constant 0 : i32
    %11 = arith.cmpi ne, %10, %c0_i32_9 : i32
    scf.if %11 {
      %c0_10 = arith.constant 0 : index
      %c0_11 = arith.constant 0 : index
      %12 = vector.load %arg7[%c0_10, %c0_11] : memref<512x128xf32, #tpu.memory_space<vmem>>, vector<512x128xf32>
      %13 = arith.truncf %12 : vector<512x128xf32> to vector<512x128xbf16>
      %c0_12 = arith.constant 0 : index
      %c0_13 = arith.constant 0 : index
      %14 = vector.load %arg5[%c0_12, %c0_13] : memref<512x128xbf16, #tpu.memory_space<vmem>>, vector<512x128xbf16>
      tpu.vector_store %arg5[%c0_12, %c0_13], %13 {strides = array<i32>} : memref<512x128xbf16, #tpu.memory_space<vmem>>, vector<512x128xbf16>,
      %cst_14 = arith.constant dense<0.000000e+00> : vector<128xf32>
      %15 = vector.multi_reduction <add>, %12, %cst_14 [0] : vector<512x128xf32> to vector<128xf32>
      %16 = vector.shape_cast %15 : vector<128xf32> to vector<1x128xf32>
      %c0_15 = arith.constant 0 : index
      %c0_16 = arith.constant 0 : index
      %17 = vector.load %arg6[%c0_15, %c0_16] : memref<8x128xf32, #tpu.memory_space<vmem>>, vector<1x128xf32>
      tpu.vector_store %arg6[%c0_15, %c0_16], %16 {strides = array<i32>} : memref<8x128xf32, #tpu.memory_space<vmem>>, vector<1x128xf32>,
      %18 = arith.mulf %12, %12 : vector<512x128xf32>
      %cst_17 = arith.constant dense<0.000000e+00> : vector<128xf32>
      %19 = vector.multi_reduction <add>, %18, %cst_17 [0] : vector<512x128xf32> to vector<128xf32>
      %20 = vector.shape_cast %19 : vector<128xf32> to vector<1x128xf32>
      %c1 = arith.constant 1 : index
      %c0_18 = arith.constant 0 : index
      %21 = vector.load %arg6[%c1, %c0_18] : memref<8x128xf32, #tpu.memory_space<vmem>>, vector<1x128xf32>
      tpu.vector_store %arg6[%c1, %c0_18], %20 {strides = array<i32>} : memref<8x128xf32, #tpu.memory_space<vmem>>, vector<1x128xf32>,
    } else {
    }
    return
  }
  func.func @transform_0(%arg0: i32, %arg1: i32, %arg2: i32) -> (i32, i32) {
    %c0_i32 = arith.constant 0 : i32
    return %arg0, %arg2 : i32, i32
  }
  func.func @transform_1(%arg0: i32, %arg1: i32, %arg2: i32) -> (i32, i32) {
    %c0_i32 = arith.constant 0 : i32
    return %arg2, %arg1 : i32, i32
  }
  func.func @transform_2(%arg0: i32, %arg1: i32, %arg2: i32) -> (i32, i32) {
    %c0_i32 = arith.constant 0 : i32
    return %arg0, %arg1 : i32, i32
  }
  func.func @transform_3(%arg0: i32, %arg1: i32, %arg2: i32) -> (i32, i32) {
    %c0_i32 = arith.constant 0 : i32
    return %arg0, %arg1 : i32, i32
  }
}

</mosaic_0001>

<bundles_post_ra>
// kernel: tpu_custom_call.1
= control target key start
LH: loop header
LB: loop body
LE: loop exit
PB: predicated region body
PF: predicated region fallthrough
CT: control target
= control target key end

     0   :  { %9 = vsyncpa [#allocation4], 0  ;;  %s3079_s0 = inlined_call_operand.vmem [shape: bf16[1024,32], index: 0, kind: input, shape index: {}]   ;;  %s3080_s1 = inlined_call_operand.vmem [shape: bf16[32,128], index: 1, kind: input, shape index: {}]   ;;  %s3081_s2 = inlined_call_operand.hbm [shape: bf16[1024,128], index: 2, kind: output, shape index: {0}]   ;;  %s3082_s3 = inlined_call_operand.hbm [shape: f32[16,128], index: 3, kind: output, shape index: {1}]  }
   0x1   :  { %11 = vsyncpa [#allocation4 + $0x1], 0 }
   0x2   :  { %12 = vsyncpa [#allocation6], 0 }
   0x3   :  { %14 = vsyncpa [#allocation6 + $0x1], 0  ;;  %s2632_s12 = smov 0   ;;  %s2634_s13 = smov 0  }
   0x4   :  { %s2636_s14 = smov 0   ;;  %s2638_s15 = smov 0  }
   0x5   :  { %s2640_s16 = smov 0   ;;  %s2642_s17 = smov 0  }
   0x6 LB: > { %s1891_s18 = sadd.s32 4294967295, %s2606_s17   ;;  %s1892_s19 = sadd.s32 4294967294, %s2606_s17   ;;  %s2606_s17 = sphi %s2642_s17, %s20_s17   ;;  %s2602_s16 = sphi %s2640_s16, %s3089_s16   ;;  %s2598_s15 = sphi %s2638_s15, %s3088_s15   ;;  %s2594_s14 = sphi %s2636_s14, %s3087_s14   ;;  %s2590_s13 = sphi %s2634_s13, %s3086_s13   ;;  %s2586_s12 = sphi %s2632_s12, %s3085_s12  }
   0x7   : > { %s39_s20 = sadd.s32 1, %s2602_s16  ;;  %s104_s21 = sadd.s32 1, %s2594_s14 }
   0x8   : > { %p41_p0 = scmp.ge.s32.totalorder %s39_s20, 2  ;;  %p114_p1 = scmp.ne.s32.totalorder %s2594_s14, %s2590_s13 }
   0x9   : > { %p115_p2 = scmp.eq.s32.totalorder %s1891_s18, 1  ;;  %p120_p3 = scmp.ne.s32.totalorder %s2590_s13, %s2586_s12 }
   0xa   : > { %s3091_s20 = smov (%p41_p0, %s39_s20), 0  ;;  %p121_p5 = scmp.eq.s32.totalorder %s1892_s19, 1 }
   0xb   : > { %p2672_p4 = por %p115_p2, %p114_p1  ;;  %s99_s23 = ssub.s32 %s2602_s16, %s3091_s20 }
   0xc   : > { %p1896_p6 = scmp.ge.s32.totalorder %s2606_s17, 1  ;;  %p102_p7 = scmp.eq.s32.totalorder %s99_s23, 0 }
   0xd   : > { %p2679_p8 = por %p121_p5, %p120_p3  ;;  %p191_p9 = scmp.lt.s32.totalorder %s2606_s17, 3 }
   0xe   : > { %s2685_s25 = scalar_select %p102_p7, %s2594_s14, %s104_s21  }
   0xf   : > { %p192_p10 = pnand %p1896_p6, %p191_p9 }
  0x10   : > { %v2462_v0 = vld [vmem:[%s3080_s1] sm:$0xff] (!%p192_p10)   ;;  %s1899_s28 = sshll.u32 (!%p192_p10), %s2598_s15, 6  ;;  %v2463_v1 = vld [vmem:[%s3080_s1 + $0x8] sm:$0xff] (!%p192_p10)   ;;  %vm623_vm0 = vcmask (!%p192_p10), 261120   ;;  %s2764_s8 = sand.u32 (!%p192_p10), 1, %s2590_s13  }
  0x11   : > { %195 = sbr.rel (%p192_p10) target bundleno = 409 (0x199), region = 28  ;;  %p232_p11 = scmp.lt.s32.totalorder (!%p192_p10), %s1899_s28, 127  ;;  %2328 = vmatprep.subr.bf16.mxu0 (!%p192_p10), %v2462_v0  ;;  %2396 = vmatprep.subr.bf16.mxu1 (!%p192_p10), %v2462_v0 }
  0x12   : > { %2329 = vmatpush3.bf16.msra.mxu0 (!%p192_p10), %v2462_v0  ;;  %2398 = vmatpush3.bf16.msra.mxu1 (!%p192_p10), %v2462_v0  ;;  %s1897_s9 = sshll.u32 (!%p192_p10), %s2764_s8, 8  ;;  %s2102_s11 = sshll.u32 (!%p192_p10), %s2598_s15, 12 }
  0x13   : > { %2330 = vmatprep.subr.bf16.mxu0 (!%p192_p10), %v2463_v1  ;;  %2397 = vmatprep.subr.bf16.mxu1 (!%p192_p10), %v2463_v1  ;;  %s2767_s10 = scalar_lea.vmem (!%p192_p10), [#allocation3], %s1897_s9  ;;  %s2913_s23 = scalar_lea.hbm (!%p192_p10), %s3081_s2, %s2102_s11 }
  0x14   : > { %s1748_s18 = sshll.u32 (!%p192_p10), %s2767_s10, 4  ;;  %s1729_s26 = scalar_lea.sflag (!%p192_p10), [#allocation4], %s2764_s8  ;;  %s2915_s18 = int_to_ptr.vmem [resolvable:$true] %s1748_s18 }
  0x15   : > { %s2496_s27 = scalar_lea.vmem (!%p192_p10), %s2915_s18, 4096 }
  0x16   : > { %2331 = vmatpush3.bf16.msra.mxu0 (!%p192_p10), %v2463_v1  ;;  %2399 = vmatpush3.bf16.msra.mxu1 (!%p192_p10), %v2463_v1  ;;  %p2497_p12 = scmp.ne.s32.totalorder (!%p192_p10), %s2915_s18, %s2496_s27 }
  0x18   : > { %s3093_s28 = smov (!%p232_p11, %s1899_s28), 127  ;;  %p2498_p13 = pnand %p2497_p12, %p2672_p4 }
  0x19   : > { %s1900_s4 = sshll.u32 %s3093_s28, 2  ;;  %s2608_s28 = smov [#allocation3]  }
  0x1a   : > { %s2697_s7 = scalar_lea.vmem %s3079_s0, %s1900_s4  ;;  %p2499_p0 = pneg %p2498_p13 }
  0x1b   : > { %v2464_v2 = vld [vmem:[%s2697_s7] sm:$0xff]   ;;  %v2465_v3 = vld [vmem:[%s2697_s7 + $0x8] sm:$0xff]   ;;  %v2466_v4 = vld [vmem:[%s2697_s7 + $0x10] sm:$0xff]   ;;  %s2500_s29 = sshll.u32 %s2608_s28, 4  ;;  %s2501_s29 = int_to_ptr.vmem [resolvable:$false] %s2500_s29 }
  0x1c   : > { %2332 = vmatprep.mubr.msk.bf16.mxu0 %vm623_vm0, %v2464_v2  ;;  %v2467_v5 = vld [vmem:[%s2697_s7 + $0x18] sm:$0xff]   ;;  %v2468_v6 = vld [vmem:[%s2697_s7 + $0x20] sm:$0xff]   ;;  %v2469_v7 = vld [vmem:[%s2697_s7 + $0x28] sm:$0xff]   ;;  %s2502_s30 = scalar_lea.vmem %s2501_s29, 8192  ;;  %p2503_p1 = scmp.lt.s32.totalorder %s2915_s18, %s2501_s29 }
  0x1d   : > { %2333 = vmatmul.mubr.msk.bf16.vlgmr.msra.gmra.mrb[0].mxu0 %vm623_vm0, %v2465_v3  ;;  %v2470_v8 = vld [vmem:[%s2697_s7 + $0x30] sm:$0xff]   ;;  %v2480_v9 = vld [vmem:[%s2697_s7 + $0x80] sm:$0xff]   ;;  %v2481_v10 = vld [vmem:[%s2697_s7 + $0x88] sm:$0xff]   ;;  %p2504_p2 = scmp.lt.s32.totalorder %s2502_s30, %s2496_s27 }
  0x1e   : > { %2336 = vmatprep.mubr.msk.bf16.mxu0 %vm623_vm0, %v2466_v4  ;;  %2364 = vmatprep.mubr.msk.bf16.mxu1 %vm623_vm0, %v2480_v9  ;;  %v2482_v11 = vld [vmem:[%s2697_s7 + $0x90] sm:$0xff]   ;;  %v2471_v12 = vld [vmem:[%s2697_s7 + $0x38] sm:$0xff]   ;;  %v2472_v13 = vld [vmem:[%s2697_s7 + $0x40] sm:$0xff]  }
  0x1f   : > { %2365 = vmatmul.mubr.msk.bf16.vlgmr.msra.gmra.mrb[0].mxu1 %vm623_vm0, %v2481_v10  ;;  %v2483_v14 = vld [vmem:[%s2697_s7 + $0x98] sm:$0xff]   ;;  %v2484_v15 = vld [vmem:[%s2697_s7 + $0xa0] sm:$0xff]   ;;  %v2473_v16 = vld [vmem:[%s2697_s7 + $0x48] sm:$0xff]   ;;  %p2505_p3 = por %p2504_p2, %p2503_p1 }
  0x20   : > { %2368 = vmatprep.mubr.msk.bf16.mxu1 %vm623_vm0, %v2482_v11  ;;  %v2485_v17 = vld [vmem:[%s2697_s7 + $0xa8] sm:$0xff]   ;;  %v2474_v18 = vld [vmem:[%s2697_s7 + $0x50] sm:$0xff]   ;;  %v2475_v20 = vld [vmem:[%s2697_s7 + $0x58] sm:$0xff]  }
  0x21   : > { %v2486_v19 = vld [vmem:[%s2697_s7 + $0xb0] sm:$0xff]   ;;  %v2487_v21 = vld [vmem:[%s2697_s7 + $0xb8] sm:$0xff]   ;;  %v2476_v22 = vld [vmem:[%s2697_s7 + $0x60] sm:$0xff]   ;;  %p2506_p5 = pnand %p2505_p3, %p2499_p0 }
  0x22   : > { %v2488_v23 = vld [vmem:[%s2697_s7 + $0xc0] sm:$0xff]   ;;  %v2477_v24 = vld [vmem:[%s2697_s7 + $0x68] sm:$0xff]   ;;  %v2478_v26 = vld [vmem:[%s2697_s7 + $0x70] sm:$0xff]  }
  0x23   : > { %v2489_v25 = vld [vmem:[%s2697_s7 + $0xc8] sm:$0xff]   ;;  %v2490_v27 = vld [vmem:[%s2697_s7 + $0xd0] sm:$0xff]   ;;  %v2479_v28 = vld [vmem:[%s2697_s7 + $0x78] sm:$0xff]  }
  0x24   : > { %v2491_v29 = vld [vmem:[%s2697_s7 + $0xd8] sm:$0xff]   ;;  %v2492_v30 = vld [vmem:[%s2697_s7 + $0xe0] sm:$0xff]   ;;  %v2493_v31 = vld [vmem:[%s2697_s7 + $0xe8] sm:$0xff]  }
  0x25   : > { %2337 = vmatmul.mubr.msk.bf16.gmra.mrb[4].mxu0 %vm623_vm0, %v2467_v5  ;;  %v2494_v32 = vld [vmem:[%s2697_s7 + $0xf0] sm:$0xff]   ;;  %v2495_v33 = vld [vmem:[%s2697_s7 + $0xf8] sm:$0xff]  }
  0x26   : > { %2340 = vmatprep.mubr.msk.bf16.mxu0 %vm623_vm0, %v2468_v6 }
  0x27   : > { %2369 = vmatmul.mubr.msk.bf16.gmra.mrb[4].mxu1 %vm623_vm0, %v2483_v14 }
  0x28   : > { %2372 = vmatprep.mubr.msk.bf16.mxu1 %vm623_vm0, %v2484_v15 }
  0x2d   : > { %2341 = vmatmul.mubr.msk.bf16.gmra.mrb[8].mxu0 %vm623_vm0, %v2469_v7 }
  0x2e   : > { %2344 = vmatprep.mubr.msk.bf16.mxu0 %vm623_vm0, %v2470_v8 }
  0x2f   : > { %2373 = vmatmul.mubr.msk.bf16.gmra.mrb[8].mxu1 %vm623_vm0, %v2485_v17 }
  0x30   : > { %2376 = vmatprep.mubr.msk.bf16.mxu1 %vm623_vm0, %v2486_v19 }
  0x35   : > { %2345 = vmatmul.mubr.msk.bf16.gmra.mrb[12].mxu0 %vm623_vm0, %v2471_v12 }
  0x36   : > { %2348 = vmatprep.mubr.msk.bf16.mxu0 %vm623_vm0, %v2472_v13 }
  0x37   : > { %2377 = vmatmul.mubr.msk.bf16.gmra.mrb[12].mxu1 %vm623_vm0, %v2487_v21 }
  0x38   : > { %2380 = vmatprep.mubr.msk.bf16.mxu1 %vm623_vm0, %v2488_v23 }
  0x3d   : > { %2349 = vmatmul.mubr.msk.bf16.gmra.mrb[16].mxu0 %vm623_vm0, %v2473_v16 }
  0x3e   : > { %2352 = vmatprep.mubr.msk.bf16.mxu0 %vm623_vm0, %v2474_v18 }
  0x3f   : > { %2381 = vmatmul.mubr.msk.bf16.gmra.mrb[16].mxu1 %vm623_vm0, %v2489_v25 }
  0x40   : > { %2384 = vmatprep.mubr.msk.bf16.mxu1 %vm623_vm0, %v2490_v27 }
  0x45   : > { %2353 = vmatmul.mubr.msk.bf16.gmra.mrb[20].mxu0 %vm623_vm0, %v2475_v20 }
  0x46   : > { %2356 = vmatprep.mubr.msk.bf16.mxu0 %vm623_vm0, %v2476_v22 }
  0x47   : > { %2385 = vmatmul.mubr.msk.bf16.gmra.mrb[20].mxu1 %vm623_vm0, %v2491_v29 }
  0x48   : > { %2388 = vmatprep.mubr.msk.bf16.mxu1 %vm623_vm0, %v2492_v30 }
  0x4d   : > { %2357 = vmatmul.mubr.msk.bf16.gmra.mrb[24].mxu0 %vm623_vm0, %v2477_v24 }
  0x4e   : > { %2360 = vmatprep.mubr.msk.bf16.mxu0 %vm623_vm0, %v2478_v26 }
  0x4f   : > { %2389 = vmatmul.mubr.msk.bf16.gmra.mrb[24].mxu1 %vm623_vm0, %v2493_v31 }
  0x50   : > { %2392 = vmatprep.mubr.msk.bf16.mxu1 %vm623_vm0, %v2494_v32 }
  0x55   : > { %2361 = vmatmul.mubr.msk.bf16.gmra.mrb[28].mxu0 %vm623_vm0, %v2479_v28 }
  0x57   : > { %2393 = vmatmul.mubr.msk.bf16.gmra.mrb[28].mxu1 %vm623_vm0, %v2495_v33 }
  0xf0   : > { %v2334_v34 = vpop.f32.mrb[0].mxu0 }
  0xf1   : > { %v754_v35 = vpop.f32.mrb[1].mxu0  ;;  %v1596_v43 = vmul.f32 %v2334_v34, %v2334_v34 }
  0xf2   : > { %v2335_v36 = vpop.f32.mrb[2].mxu0  ;;  %v1594_v39 = vmul.f32 %v754_v35, %v754_v35  ;;  %v2773_v4 = vpop.f32.mrb[0].mxu1 }
  0xf3   : > { %v2111_v37 = vpack.c.bf16 %v2335_v36, %v2334_v34  ;;  %v757_v38 = vpop.f32.mrb[3].mxu0  ;;  %v1597_v46 = vmul.f32 %v2335_v36, %v2335_v36  ;;  %v2775_v6 = vpop.f32.mrb[1].mxu1 }
  0xf4   : > { %v2106_v40 = vpack.c.bf16 %v757_v38, %v754_v35  ;;  %v1524_v41 = vadd.f32 %v757_v38, %v754_v35  ;;  %v1595_v42 = vmul.f32 %v757_v38, %v757_v38  ;;  %v2777_v11 = vpop.f32.mrb[2].mxu1 }
  0xf5   : > { %2263 = vst [vmem:[%s2767_s10 + $0x8] sm:$0xff] %v2111_v37   ;;  %v2191_v14 = vpack.c.bf16 %v2777_v11, %v2773_v4  ;;  %v2781_v15 = vpop.f32.mrb[3].mxu1 }
  0xf6   : > { %2107 = vst [vmem:[%s2767_s10] sm:$0xff] %v2106_v40   ;;  %v1525_v44 = vadd.f32 %v2334_v34, %v1524_v41  ;;  %v1658_v45 = vadd.f32 %v1595_v42, %v1594_v39  ;;  %v2186_v20 = vpack.c.bf16 %v2781_v15, %v2775_v6 }
  0xf7   : > { %2279 = vst [vmem:[%s2767_s10 + $0x88] sm:$0xff] %v2191_v14  }
  0xf8   : > { %v1659_v47 = vadd.f32 %v1658_v45, %v1596_v43  ;;  %v2338_v48 = vpop.f32.mrb[4].mxu0  ;;  %v1526_v49 = vadd.f32 %v2335_v36, %v1525_v44  ;;  %2278 = vst [vmem:[%s2767_s10 + $0x80] sm:$0xff] %v2186_v20  }
  0xf9   : > { %v770_v50 = vpop.f32.mrb[5].mxu0  ;;  %v1600_v61 = vmul.f32 %v2338_v48, %v2338_v48 }
  0xfa   : > { %v1527_v51 = vadd.f32 %v1526_v49, %v770_v50  ;;  %v1598_v52 = vmul.f32 %v770_v50, %v770_v50  ;;  %v1660_v53 = vadd.f32 %v1659_v47, %v1597_v46  ;;  %v2339_v54 = vpop.f32.mrb[6].mxu0  ;;  %v2789_v28 = vpop.f32.mrb[4].mxu1 }
  0xfb   : > { %v2121_v55 = vpack.c.bf16 %v2339_v54, %v2338_v48  ;;  %v773_v56 = vpop.f32.mrb[7].mxu0  ;;  %v1601_v0 = vmul.f32 %v2339_v54, %v2339_v54  ;;  %v2791_v30 = vpop.f32.mrb[5].mxu1 }
  0xfc   : > { %v1661_v57 = vadd.f32 %v1660_v53, %v1598_v52  ;;  %v2116_v58 = vpack.c.bf16 %v773_v56, %v770_v50  ;;  %v1528_v59 = vadd.f32 %v1527_v51, %v773_v56  ;;  %v1599_v60 = vmul.f32 %v773_v56, %v773_v56  ;;  %v2793_v35 = vpop.f32.mrb[6].mxu1 }
  0xfd   : > { %2265 = vst [vmem:[%s2767_s10 + $0x18] sm:$0xff] %v2121_v55   ;;  %v2201_v38 = vpack.c.bf16 %v2793_v35, %v2789_v28  ;;  %v2797_v39 = vpop.f32.mrb[7].mxu1 }
  0xfe   : > { %2264 = vst [vmem:[%s2767_s10 + $0x10] sm:$0xff] %v2116_v58   ;;  %v1529_v62 = vadd.f32 %v2338_v48, %v1528_v59  ;;  %v1662_v63 = vadd.f32 %v1661_v57, %v1599_v60  ;;  %v2196_v44 = vpack.c.bf16 %v2797_v39, %v2791_v30 }
  0xff   : > { %2281 = vst [vmem:[%s2767_s10 + $0x98] sm:$0xff] %v2201_v38  }
 0x100   : > { %v1663_v1 = vadd.f32 %v1662_v63, %v1600_v61  ;;  %v2342_v2 = vpop.f32.mrb[8].mxu0  ;;  %v1530_v3 = vadd.f32 %v2339_v54, %v1529_v62  ;;  %2280 = vst [vmem:[%s2767_s10 + $0x90] sm:$0xff] %v2196_v44  }
 0x101   : > { %v786_v5 = vpop.f32.mrb[9].mxu0  ;;  %v1604_v21 = vmul.f32 %v2342_v2, %v2342_v2 }
 0x102   : > { %v1531_v7 = vadd.f32 %v1530_v3, %v786_v5  ;;  %v1602_v8 = vmul.f32 %v786_v5, %v786_v5  ;;  %v1664_v9 = vadd.f32 %v1663_v1, %v1601_v0  ;;  %v2343_v10 = vpop.f32.mrb[10].mxu0  ;;  %v2805_v52 = vpop.f32.mrb[8].mxu1 }
 0x103   : > { %v2131_v12 = vpack.c.bf16 %v2343_v10, %v2342_v2  ;;  %v789_v13 = vpop.f32.mrb[11].mxu0  ;;  %v1605_v24 = vmul.f32 %v2343_v10, %v2343_v10  ;;  %v2807_v54 = vpop.f32.mrb[9].mxu1 }
 0x104   : > { %v1665_v16 = vadd.f32 %v1664_v9, %v1602_v8  ;;  %v2126_v17 = vpack.c.bf16 %v789_v13, %v786_v5  ;;  %v1532_v18 = vadd.f32 %v1531_v7, %v789_v13  ;;  %v1603_v19 = vmul.f32 %v789_v13, %v789_v13  ;;  %v2809_v59 = vpop.f32.mrb[10].mxu1 }
 0x105   : > { %2267 = vst [vmem:[%s2767_s10 + $0x28] sm:$0xff] %v2131_v12   ;;  %v2211_v62 = vpack.c.bf16 %v2809_v59, %v2805_v52  ;;  %v2813_v63 = vpop.f32.mrb[11].mxu1 }
 0x106   : > { %2266 = vst [vmem:[%s2767_s10 + $0x20] sm:$0xff] %v2126_v17   ;;  %v1533_v22 = vadd.f32 %v2342_v2, %v1532_v18  ;;  %v1666_v23 = vadd.f32 %v1665_v16, %v1603_v19  ;;  %v2206_v5 = vpack.c.bf16 %v2813_v63, %v2807_v54 }
 0x107   : > { %2283 = vst [vmem:[%s2767_s10 + $0xa8] sm:$0xff] %v2211_v62  }
 0x108   : > { %v1667_v25 = vadd.f32 %v1666_v23, %v1604_v21  ;;  %v2346_v26 = vpop.f32.mrb[12].mxu0  ;;  %v1534_v27 = vadd.f32 %v2343_v10, %v1533_v22  ;;  %2282 = vst [vmem:[%s2767_s10 + $0xa0] sm:$0xff] %v2206_v5  }
 0x109   : > { %v802_v29 = vpop.f32.mrb[13].mxu0  ;;  %v1608_v45 = vmul.f32 %v2346_v26, %v2346_v26 }
 0x10a   : > { %v1535_v31 = vadd.f32 %v1534_v27, %v802_v29  ;;  %v1606_v32 = vmul.f32 %v802_v29, %v802_v29  ;;  %v1668_v33 = vadd.f32 %v1667_v25, %v1605_v24  ;;  %v2347_v34 = vpop.f32.mrb[14].mxu0  ;;  %v2821_v16 = vpop.f32.mrb[12].mxu1 }
 0x10b   : > { %v2141_v36 = vpack.c.bf16 %v2347_v34, %v2346_v26  ;;  %v805_v37 = vpop.f32.mrb[15].mxu0  ;;  %v1609_v48 = vmul.f32 %v2347_v34, %v2347_v34  ;;  %v2823_v18 = vpop.f32.mrb[13].mxu1 }
 0x10c   : > { %v1669_v40 = vadd.f32 %v1668_v33, %v1606_v32  ;;  %v2136_v41 = vpack.c.bf16 %v805_v37, %v802_v29  ;;  %v1536_v42 = vadd.f32 %v1535_v31, %v805_v37  ;;  %v1607_v43 = vmul.f32 %v805_v37, %v805_v37  ;;  %v2825_v23 = vpop.f32.mrb[14].mxu1 }
 0x10d   : > { %2269 = vst [vmem:[%s2767_s10 + $0x38] sm:$0xff] %v2141_v36   ;;  %v2829_v27 = vpop.f32.mrb[15].mxu1 }
 0x10e   : > { %2268 = vst [vmem:[%s2767_s10 + $0x30] sm:$0xff] %v2136_v41   ;;  %v1537_v46 = vadd.f32 %v2346_v26, %v1536_v42  ;;  %v1670_v47 = vadd.f32 %v1669_v40, %v1607_v43  ;;  %v2221_v26 = vpack.c.bf16 %v2825_v23, %v2821_v16 }
 0x110   : > { %v1671_v49 = vadd.f32 %v1670_v47, %v1608_v45  ;;  %v2350_v50 = vpop.f32.mrb[16].mxu0  ;;  %v1538_v51 = vadd.f32 %v2347_v34, %v1537_v46  ;;  %2285 = vst [vmem:[%s2767_s10 + $0xb8] sm:$0xff] %v2221_v26   ;;  %v2216_v34 = vpack.c.bf16 %v2829_v27, %v2823_v18 }
 0x111   : > { %v818_v53 = vpop.f32.mrb[17].mxu0  ;;  %v1612_v7 = vmul.f32 %v2350_v50, %v2350_v50 }
 0x112   : > { %v1539_v55 = vadd.f32 %v1538_v51, %v818_v53  ;;  %v1610_v56 = vmul.f32 %v818_v53, %v818_v53  ;;  %v1672_v57 = vadd.f32 %v1671_v49, %v1609_v48  ;;  %v2351_v58 = vpop.f32.mrb[18].mxu0  ;;  %2284 = vst [vmem:[%s2767_s10 + $0xb0] sm:$0xff] %v2216_v34   ;;  %v2837_v44 = vpop.f32.mrb[16].mxu1 }
 0x113   : > { %v2151_v60 = vpack.c.bf16 %v2351_v58, %v2350_v50  ;;  %v821_v61 = vpop.f32.mrb[19].mxu0  ;;  %v1613_v10 = vmul.f32 %v2351_v58, %v2351_v58  ;;  %v2839_v46 = vpop.f32.mrb[17].mxu1 }
 0x114   : > { %v1673_v0 = vadd.f32 %v1672_v57, %v1610_v56  ;;  %v2146_v1 = vpack.c.bf16 %v821_v61, %v818_v53  ;;  %v1540_v2 = vadd.f32 %v1539_v55, %v821_v61  ;;  %v1611_v3 = vmul.f32 %v821_v61, %v821_v61  ;;  %v2841_v51 = vpop.f32.mrb[18].mxu1 }
 0x115   : > { %2271 = vst [vmem:[%s2767_s10 + $0x48] sm:$0xff] %v2151_v60   ;;  %v2231_v56 = vpack.c.bf16 %v2841_v51, %v2837_v44  ;;  %v2845_v57 = vpop.f32.mrb[19].mxu1 }
 0x116   : > { %2270 = vst [vmem:[%s2767_s10 + $0x40] sm:$0xff] %v2146_v1   ;;  %v1541_v8 = vadd.f32 %v2350_v50, %v1540_v2  ;;  %v1674_v9 = vadd.f32 %v1673_v0, %v1611_v3  ;;  %v2226_v0 = vpack.c.bf16 %v2845_v57, %v2839_v46 }
 0x117   : > { %2287 = vst [vmem:[%s2767_s10 + $0xc8] sm:$0xff] %v2231_v56  }
 0x118   : > { %v1675_v12 = vadd.f32 %v1674_v9, %v1612_v7  ;;  %v2354_v13 = vpop.f32.mrb[20].mxu0  ;;  %v1542_v14 = vadd.f32 %v2351_v58, %v1541_v8  ;;  %2286 = vst [vmem:[%s2767_s10 + $0xc0] sm:$0xff] %v2226_v0  }
 0x119   : > { %v834_v17 = vpop.f32.mrb[21].mxu0  ;;  %v1616_v36 = vmul.f32 %v2354_v13, %v2354_v13 }
 0x11a   : > { %v1543_v19 = vadd.f32 %v1542_v14, %v834_v17  ;;  %v1614_v20 = vmul.f32 %v834_v17, %v834_v17  ;;  %v1676_v21 = vadd.f32 %v1675_v12, %v1613_v10  ;;  %v2355_v22 = vpop.f32.mrb[22].mxu0  ;;  %v2853_v10 = vpop.f32.mrb[20].mxu1 }
 0x11b   : > { %v2161_v24 = vpack.c.bf16 %v2355_v22, %v2354_v13  ;;  %v837_v25 = vpop.f32.mrb[23].mxu0  ;;  %v1617_v40 = vmul.f32 %v2355_v22, %v2355_v22 }
 0x11c   : > { %v1677_v29 = vadd.f32 %v1676_v21, %v1614_v20  ;;  %v2156_v31 = vpack.c.bf16 %v837_v25, %v834_v17  ;;  %v1544_v32 = vadd.f32 %v1543_v19, %v837_v25  ;;  %v1615_v33 = vmul.f32 %v837_v25, %v837_v25 }
 0x11d   : > { %2273 = vst [vmem:[%s2767_s10 + $0x58] sm:$0xff] %v2161_v24  }
 0x11e   : > { %2272 = vst [vmem:[%s2767_s10 + $0x50] sm:$0xff] %v2156_v31   ;;  %v1545_v37 = vadd.f32 %v2354_v13, %v1544_v32  ;;  %v1678_v38 = vadd.f32 %v1677_v29, %v1615_v33  ;;  %v2855_v13 = vpop.f32.mrb[21].mxu1 }
 0x11f   : > { %v2857_v21 = vpop.f32.mrb[22].mxu1 }
 0x120   : > { %v1679_v41 = vadd.f32 %v1678_v38, %v1616_v36  ;;  %v2358_v42 = vpop.f32.mrb[24].mxu0  ;;  %v1546_v43 = vadd.f32 %v2355_v22, %v1545_v37  ;;  %v2241_v25 = vpack.c.bf16 %v2857_v21, %v2853_v10  ;;  %v2861_v26 = vpop.f32.mrb[23].mxu1 }
 0x121   : > { %v850_v45 = vpop.f32.mrb[25].mxu0  ;;  %v1620_v1 = vmul.f32 %v2358_v42, %v2358_v42  ;;  %v2236_v34 = vpack.c.bf16 %v2861_v26, %v2855_v13 }
 0x122   : > { %v1547_v47 = vadd.f32 %v1546_v43, %v850_v45  ;;  %v1618_v48 = vmul.f32 %v850_v45, %v850_v45  ;;  %v1680_v49 = vadd.f32 %v1679_v41, %v1617_v40  ;;  %v2359_v50 = vpop.f32.mrb[26].mxu0  ;;  %2289 = vst [vmem:[%s2767_s10 + $0xd8] sm:$0xff] %v2241_v25   ;;  %v1626_v43 = vmul.f32 %v2775_v6, %v2775_v6 }
 0x123   : > { %v2171_v53 = vpack.c.bf16 %v2359_v50, %v2358_v42  ;;  %v853_v55 = vpop.f32.mrb[27].mxu0  ;;  %v1621_v5 = vmul.f32 %v2359_v50, %v2359_v50  ;;  %2288 = vst [vmem:[%s2767_s10 + $0xd0] sm:$0xff] %v2236_v34  }
 0x124   : > { %v1681_v58 = vadd.f32 %v1680_v49, %v1618_v48  ;;  %v2166_v60 = vpack.c.bf16 %v853_v55, %v850_v45  ;;  %v1548_v61 = vadd.f32 %v1547_v47, %v853_v55  ;;  %v1619_v62 = vmul.f32 %v853_v55, %v853_v55  ;;  %v2871_v45 = vpop.f32.mrb[24].mxu1 }
 0x125   : > { %2275 = vst [vmem:[%s2767_s10 + $0x68] sm:$0xff] %v2171_v53   ;;  %v2873_v47 = vpop.f32.mrb[25].mxu1 }
 0x126   : > { %2274 = vst [vmem:[%s2767_s10 + $0x60] sm:$0xff] %v2166_v60   ;;  %v1549_v2 = vadd.f32 %v2358_v42, %v1548_v61  ;;  %v1682_v3 = vadd.f32 %v1681_v58, %v1619_v62  ;;  %v1627_v60 = vmul.f32 %v2781_v15, %v2781_v15 }
 0x128   : > { %v1683_v7 = vadd.f32 %v1682_v3, %v1620_v1  ;;  %v2362_v8 = vpop.f32.mrb[28].mxu0  ;;  %v1550_v9 = vadd.f32 %v2359_v50, %v1549_v2  ;;  %v2876_v50 = vpop.f32.mrb[26].mxu1  ;;  %v1629_v1 = vmul.f32 %v2777_v11, %v2777_v11 }
 0x129   : > { %v866_v12 = vpop.f32.mrb[29].mxu0  ;;  %v1624_v36 = vmul.f32 %v2362_v8, %v2362_v8  ;;  %v2251_v53 = vpack.c.bf16 %v2876_v50, %v2871_v45  ;;  %v2880_v55 = vpop.f32.mrb[27].mxu1 }
 0x12a   : > { %v1551_v14 = vadd.f32 %v1550_v9, %v866_v12  ;;  %v1622_v17 = vmul.f32 %v866_v12, %v866_v12  ;;  %v1684_v19 = vadd.f32 %v1683_v7, %v1621_v5  ;;  %v2363_v20 = vpop.f32.mrb[30].mxu0  ;;  %v2246_v61 = vpack.c.bf16 %v2880_v55, %v2873_v47  ;;  %v2897_v5 = vpop.f32.mrb[28].mxu1 }
 0x12b   : > { %v2181_v22 = vpack.c.bf16 %v2363_v20, %v2362_v8  ;;  %v869_v24 = vpop.f32.mrb[31].mxu0  ;;  %v1625_v40 = vmul.f32 %v2363_v20, %v2363_v20  ;;  %2291 = vst [vmem:[%s2767_s10 + $0xe8] sm:$0xff] %v2251_v53   ;;  %v2901_v7 = vpop.f32.mrb[29].mxu1 }
 0x12c   : > { %v1685_v29 = vadd.f32 %v1684_v19, %v1622_v17  ;;  %v2176_v31 = vpack.c.bf16 %v869_v24, %v866_v12  ;;  %v1552_v32 = vadd.f32 %v1551_v14, %v869_v24  ;;  %v1623_v33 = vmul.f32 %v869_v24, %v869_v24  ;;  %2290 = vst [vmem:[%s2767_s10 + $0xe0] sm:$0xff] %v2246_v61   ;;  %v2904_v9 = vpop.f32.mrb[30].mxu1 }
 0x12d   : > { %2277 = vst [vmem:[%s2767_s10 + $0x78] sm:$0xff] %v2181_v22   ;;  %v2908_v12 = vpop.f32.mrb[31].mxu1  ;;  %v1631_v17 = vmul.f32 %v2797_v39, %v2797_v39 }
 0x12e   : > { %2276 = vst [vmem:[%s2767_s10 + $0x70] sm:$0xff] %v2176_v31   ;;  %v1553_v37 = vadd.f32 %v2362_v8, %v1552_v32  ;;  %v1686_v38 = vadd.f32 %v1685_v29, %v1623_v33  ;;  %v2256_v19 = vpack.c.bf16 %v2908_v12, %v2901_v7 }
 0x130   : > { %v1687_v41 = vadd.f32 %v1686_v38, %v1624_v36  ;;  %v1554_v42 = vadd.f32 %v2363_v20, %v1553_v37  ;;  %v1632_v20 = vmul.f32 %v2789_v28, %v2789_v28  ;;  %2292 = vst [vmem:[%s2767_s10 + $0xf0] sm:$0xff] %v2256_v19  }
 0x132   : > { %v1555_v48 = vadd.f32 %v1554_v42, %v2775_v6  ;;  %v1688_v49 = vadd.f32 %v1687_v41, %v1625_v40  ;;  %v1628_v6 = vmul.f32 %v2773_v4, %v2773_v4 }
 0x134   : > { %v1689_v56 = vadd.f32 %v1688_v49, %v1626_v43  ;;  %v1556_v58 = vadd.f32 %v1555_v48, %v2781_v15  ;;  %v1630_v15 = vmul.f32 %v2791_v30, %v2791_v30 }
 0x136   : > { %v1557_v62 = vadd.f32 %v2773_v4, %v1556_v58  ;;  %v1690_v0 = vadd.f32 %v1689_v56, %v1627_v60 }
 0x138   : > { %v1691_v2 = vadd.f32 %v1690_v0, %v1628_v6  ;;  %v1558_v3 = vadd.f32 %v2777_v11, %v1557_v62  ;;  %v2261_v11 = vpack.c.bf16 %v2904_v9, %v2897_v5 }
 0x13a   : > { %v1559_v4 = vadd.f32 %v1558_v3, %v2791_v30  ;;  %v1692_v8 = vadd.f32 %v1691_v2, %v1629_v1  ;;  %2293 = vst [vmem:[%s2767_s10 + $0xf8] sm:$0xff] %v2261_v11  }
 0x13c   : > { %v1693_v30 = vadd.f32 %v1692_v8, %v1630_v15  ;;  %v1560_v14 = vadd.f32 %v1559_v4, %v2797_v39 }
 0x13e   : > { %v1561_v22 = vadd.f32 %v2789_v28, %v1560_v14  ;;  %v1694_v24 = vadd.f32 %v1693_v30, %v1631_v17 }
 0x13f   : > { %2509 = shalt.err (!%p2506_p5)
}
 0x140   : > { %s2510_s4 = scalar_lea.hbm %s2913_s23, 4096  ;;  %s2514_s7 = scalar_lea.hbm %s3081_s2, 8192 }
 0x141   : > { %p2511_p6 = scmp.ne.s32.totalorder %s2913_s23, %s2510_s4  ;;  %p2515_p10 = scmp.lt.u32.totalorder %s2913_s23, %s3081_s2 }
 0x142   : > { %p2516_p11 = scmp.lt.u32.totalorder %s2514_s7, %s2510_s4  ;;  %p2518_p13 = scmp.lt.u32.totalorder %s2510_s4, %s2913_s23 }
 0x143   : > { %p2512_p7 = pnand %p2511_p6, %p2672_p4 }
 0x144   : > { %p2517_p12 = por %p2516_p11, %p2515_p10 }
 0x145   : > { %p2513_p9 = pneg %p2512_p7 }
 0x146   : > { %p2519_p0 = por %p2518_p13, %p2517_p12 }
 0x148   : > { %p2520_p1 = pnand %p2519_p0, %p2513_p9 }
 0x14a   : > { %2523 = shalt.err (!%p2520_p1)
}
 0x14b   : > { %s2609_s11 = smov 64   ;;  %s2610_s19 = smov 4   ;;  %v1633_v28 = vmul.f32 %v2793_v35, %v2793_v35  ;;  %v1695_v39 = vadd.f32 %v1694_v24, %v1632_v20  ;;  %v1562_v25 = vadd.f32 %v2793_v35, %v1561_v22  ;;  %v1634_v29 = vmul.f32 %v2807_v54, %v2807_v54 }
 0x14c   : > { %2400 = dma.vmem_to_hbm [thread:$0]  (%p2672_p4), %s2915_s18, 4096, %s2913_s23, %s1729_s26, %s2609_s11, %s2609_s11, %s2610_s19   ;;  %v1635_v36 = vmul.f32 %v2813_v63, %v2813_v63  ;;  %v1636_v37 = vmul.f32 %v2805_v52, %v2805_v52  ;;  %v1637_v35 = vmul.f32 %v2809_v59, %v2809_v59  ;;  %v1639_v53 = vmul.f32 %v2829_v27, %v2829_v27 }
 0x14d   : > { %v1563_v31 = vadd.f32 %v1562_v25, %v2807_v54  ;;  %v1696_v32 = vadd.f32 %v1695_v39, %v1633_v28  ;;  %v1638_v54 = vmul.f32 %v2823_v18, %v2823_v18  ;;  %v1643_v1 = vmul.f32 %v2845_v57, %v2845_v57  ;;  %s1898_s18 = sshll.u32 %s2764_s8, 3  ;;  %s2035_s21 = sshll.u32 %s2598_s15, 7 }
 0x14e   : > { %v1647_v14 = vmul.f32 %v2861_v26, %v2861_v26  ;;  %v1651_v25 = vmul.f32 %v2880_v55, %v2880_v55  ;;  %s230_s23 = scalar_lea.vmem [#allocation5], %s1898_s18  ;;  %s3031_s29 = scalar_lea.hbm %s3082_s3, %s2035_s21 }
 0x14f   : > { %v1697_v33 = vadd.f32 %v1696_v32, %v1634_v29  ;;  %v1564_v34 = vadd.f32 %v1563_v31, %v2813_v63  ;;  %s1765_s26 = sshll.u32 %s230_s23, 4  ;;  %s1734_s30 = scalar_lea.sflag [#allocation6], %s2764_s8  ;;  %s3033_s26 = int_to_ptr.vmem [resolvable:$true] %s1765_s26 }
 0x150   : > { %s2524_s4 = scalar_lea.vmem %s3033_s26, 128  ;;  %s2611_s15 = smov [#allocation5]  }
 0x151   : > { %v1565_v38 = vadd.f32 %v2805_v52, %v1564_v34  ;;  %v1698_v40 = vadd.f32 %v1697_v33, %v1635_v36  ;;  %v1640_v52 = vmul.f32 %v2821_v16, %v2821_v16  ;;  %p2525_p2 = scmp.ne.s32.totalorder %s3033_s26, %s2524_s4  ;;  %s2528_s5 = sshll.u32 %s2611_s15, 4  ;;  %s2529_s5 = int_to_ptr.vmem [resolvable:$false] %s2528_s5 }
 0x152   : > { %s2530_s6 = scalar_lea.vmem %s2529_s5, 256  ;;  %p2531_p6 = scmp.lt.s32.totalorder %s3033_s26, %s2529_s5 }
 0x153   : > { %v1699_v41 = vadd.f32 %v1698_v40, %v1636_v37  ;;  %v1566_v42 = vadd.f32 %v2809_v59, %v1565_v38  ;;  %v1641_v59 = vmul.f32 %v2825_v23, %v2825_v23  ;;  %v1656_v38 = vmul.f32 %v2897_v5, %v2897_v5  ;;  %p2526_p3 = pnand %p2525_p2, %p2672_p4  ;;  %p2532_p7 = scmp.lt.s32.totalorder %s2530_s6, %s2524_s4 }
 0x155   : > { %v1567_v43 = vadd.f32 %v1566_v42, %v2823_v18  ;;  %v1700_v48 = vadd.f32 %v1699_v41, %v1637_v35  ;;  %v1642_v18 = vmul.f32 %v2839_v46, %v2839_v46  ;;  %v1657_v35 = vmul.f32 %v2904_v9, %v2904_v9  ;;  %p2527_p5 = pneg %p2526_p3  ;;  %p2533_p9 = por %p2532_p7, %p2531_p6 }
 0x157   : > { %v1701_v49 = vadd.f32 %v1700_v48, %v1638_v54  ;;  %v1568_v63 = vadd.f32 %v1567_v43, %v2829_v27  ;;  %p2534_p10 = pnand %p2533_p9, %p2527_p5 }
 0x159   : > { %v1569_v56 = vadd.f32 %v2821_v16, %v1568_v63  ;;  %v1702_v58 = vadd.f32 %v1701_v49, %v1639_v53  ;;  %v1644_v16 = vmul.f32 %v2837_v44, %v2837_v44 }
 0x15b   : > { %v1703_v60 = vadd.f32 %v1702_v58, %v1640_v52  ;;  %v1570_v61 = vadd.f32 %v2825_v23, %v1569_v56  ;;  %v1645_v23 = vmul.f32 %v2841_v51, %v2841_v51 }
 0x15d   : > { %v1571_v6 = vadd.f32 %v1570_v61, %v2839_v46  ;;  %v1704_v62 = vadd.f32 %v1703_v60, %v1641_v59  ;;  %v1646_v46 = vmul.f32 %v2855_v13, %v2855_v13 }
 0x15f   : > { %v1705_v0 = vadd.f32 %v1704_v62, %v1642_v18  ;;  %v1572_v27 = vadd.f32 %v1571_v6, %v2845_v57 }
 0x161   : > { %v1573_v2 = vadd.f32 %v2837_v44, %v1572_v27  ;;  %v1706_v3 = vadd.f32 %v1705_v0, %v1643_v1  ;;  %v1648_v44 = vmul.f32 %v2853_v10, %v2853_v10 }
 0x163   : > { %v1707_v15 = vadd.f32 %v1706_v3, %v1644_v16  ;;  %v1574_v4 = vadd.f32 %v2841_v51, %v1573_v2  ;;  %v1649_v51 = vmul.f32 %v2857_v21, %v2857_v21 }
 0x165   : > { %v1575_v8 = vadd.f32 %v1574_v4, %v2855_v13  ;;  %v1708_v11 = vadd.f32 %v1707_v15, %v1645_v23  ;;  %v1650_v13 = vmul.f32 %v2873_v47, %v2873_v47 }
 0x167   : > { %v1709_v30 = vadd.f32 %v1708_v11, %v1646_v46  ;;  %v1576_v57 = vadd.f32 %v1575_v8, %v2861_v26 }
 0x169   : > { %v1577_v17 = vadd.f32 %v2853_v10, %v1576_v57  ;;  %v1710_v19 = vadd.f32 %v1709_v30, %v1647_v14  ;;  %v1652_v10 = vmul.f32 %v2871_v45, %v2871_v45 }
 0x16b   : > { %v1711_v20 = vadd.f32 %v1710_v19, %v1648_v44  ;;  %v1578_v22 = vadd.f32 %v2857_v21, %v1577_v17  ;;  %v1653_v21 = vmul.f32 %v2876_v50, %v2876_v50 }
 0x16d   : > { %v1579_v24 = vadd.f32 %v1578_v22, %v2873_v47  ;;  %v1712_v28 = vadd.f32 %v1711_v20, %v1649_v51  ;;  %v1654_v47 = vmul.f32 %v2901_v7, %v2901_v7 }
 0x16f   : > { %v1713_v39 = vadd.f32 %v1712_v28, %v1650_v13  ;;  %v1580_v26 = vadd.f32 %v1579_v24, %v2880_v55 }
 0x171   : > { %v1581_v29 = vadd.f32 %v2871_v45, %v1580_v26  ;;  %v1714_v31 = vadd.f32 %v1713_v39, %v1651_v25  ;;  %v1655_v45 = vmul.f32 %v2908_v12, %v2908_v12 }
 0x173   : > { %v1715_v32 = vadd.f32 %v1714_v31, %v1652_v10  ;;  %v1582_v33 = vadd.f32 %v2876_v50, %v1581_v29 }
 0x175   : > { %v1583_v34 = vadd.f32 %v1582_v33, %v2901_v7  ;;  %v1716_v36 = vadd.f32 %v1715_v32, %v1653_v21 }
 0x177   : > { %v1717_v55 = vadd.f32 %v1716_v36, %v1654_v47  ;;  %v1584_v37 = vadd.f32 %v1583_v34, %v2908_v12 }
 0x179   : > { %v1585_v40 = vadd.f32 %v2897_v5, %v1584_v37  ;;  %v1718_v50 = vadd.f32 %v1717_v55, %v1655_v45 }
 0x17b   : > { %v1586_v41 = vadd.f32 %v2904_v9, %v1585_v40  ;;  %v1719_v7 = vadd.f32 %v1718_v50, %v1656_v38 }
 0x17d   : > { %v1587_v42 = vrot.slane %v1586_v41, 4  ;;  %v1720_v54 = vadd.f32 %v1719_v7, %v1657_v35 }
 0x17f   : > { %v1588_v43 = vadd.f32 %v1587_v42, %v1586_v41  ;;  %v1721_v48 = vrot.slane %v1720_v54, 4 }
 0x181   : > { %v1589_v49 = vrot.slane %v1588_v43, 2  ;;  %v1722_v12 = vadd.f32 %v1721_v48, %v1720_v54 }
 0x183   : > { %v1590_v63 = vadd.f32 %v1589_v49, %v1588_v43  ;;  %v1723_v53 = vrot.slane %v1722_v12, 2 }
 0x185   : > { %v1591_v5 = vrot.slane %v1590_v63, 1  ;;  %v1724_v52 = vadd.f32 %v1723_v53, %v1722_v12 }
 0x187   : > { %v1592_v56 = vadd.f32 %v1591_v5, %v1590_v63  ;;  %v1725_v58 = vrot.slane %v1724_v52, 1 }
 0x189   : > { %1593 = vst [vmem:[%s230_s23] sm:$0x1] %v1592_v56  ;;  %v1726_v9 = vadd.f32 %v1725_v58, %v1724_v52 }
 0x18b   : > { %1727 = vst [vmem:[%s230_s23 + $0x1] sm:$0x1] %v1726_v9 }
 0x18c   : > { %2537 = shalt.err (!%p2534_p10)
}
 0x18d   : > { %s2538_s8 = scalar_lea.hbm %s3031_s29, 128  ;;  %s2542_s10 = scalar_lea.hbm %s3082_s3, 256 }
 0x18e   : > { %p2539_p11 = scmp.ne.s32.totalorder %s3031_s29, %s2538_s8  ;;  %p2543_p0 = scmp.lt.u32.totalorder %s3031_s29, %s3082_s3 }
 0x18f   : > { %p2544_p1 = scmp.lt.u32.totalorder %s2542_s10, %s2538_s8  ;;  %p2546_p3 = scmp.lt.u32.totalorder %s2538_s8, %s3031_s29 }
 0x190   : > { %p2540_p12 = pnand %p2539_p11, %p2672_p4 }
 0x191   : > { %p2545_p2 = por %p2544_p1, %p2543_p0 }
 0x192   : > { %p2541_p13 = pneg %p2540_p12 }
 0x193   : > { %p2547_p5 = por %p2546_p3, %p2545_p2 }
 0x195   : > { %p2548_p6 = pnand %p2547_p5, %p2541_p13 }
 0x197   : > { %2551 = shalt.err (!%p2548_p6)
}
 0x198   : > { %2401 = dma.vmem_to_hbm [thread:$0]  (%p2672_p4), %s3033_s26, 128, %s3031_s29, %s1734_s30  }
 0x199 PF: > { %p2411_p7 = scmp.ge.s32.totalorder %s2606_s17, 2  ;;  %s1777_s18 = sand.u32 1, %s2586_s12  }
 0x19a   : > { %s1778_s21 = scalar_lea.sflag [#allocation4], %s1777_s18 }
 0x19b   : > { %p2405_p9 = pnand %p2411_p7, %p2679_p8 }
 0x19d   : > { %2577 = dma.done.wait (!%p2405_p9), %s1778_s21, 4096  }
 0x19e   : > { %2579 = vsyncadd (!%p2405_p9), %s1778_s21, 4294963200  ;;  %s1787_s23 = scalar_lea.sflag [#allocation6], %s1777_s18 }
 0x19f   : > { %2581 = dma.done.wait (!%p2405_p9), %s1787_s23, 128  }
 0x1a0   : > { %2583 = vsyncadd (!%p2405_p9), %s1787_s23, 4294967168  ;;  %s20_s17 = sadd.s32 1, %s2606_s17   ;;  %s3085_s12 = smov %s2590_s13 }
 0x1a1   : > { %p17_p10 = scmp.ge.s32.totalorder %s20_s17, 4   ;;  %s3086_s13 = smov %s2594_s14 }
 0x1a2   : > { %s3087_s14 = smov %s2685_s25  ;;  %s3088_s15 = smov %s2602_s16 }
 0x1a3   : > { %s3089_s16 = smov %s3091_s20  ;;  %19 = sbr.rel (!%p17_p10) target bundleno = 6 (0x6), region = 91 }
 0x1aa   :  { %1792 = vsyncpa [#allocation4], 1 }
 0x1ab   :  { %1794 = vsyncpa [#allocation4 + $0x1], 1 }
 0x1ac   :  { %1795 = vsyncpa [#allocation6], 1 }
 0x1ad   :  { %1797 = vsyncpa [#allocation6 + $0x1], 1 }

</bundles_post_ra>
